<compile_context>
chip_gen: v6e
topology: v6e:2x2x1
jax: 0.10.0
libtpu: 0.0.40
codegen_flags: <defaults>
</compile_context>

<pallas_src>
import functools

import jax
import jax.numpy as jnp
import numpy as np
from jax.experimental import pallas as pl
from jax.experimental.pallas import tpu as pltpu


def _round_up(x: int, m: int) -> int:
    return (x + m - 1) // m * m


def _min_batch_tiles() -> int:
    """Best-effort detection: 2 on chips whose Pallas grid is sharded across
    two TensorCores (v7x / v4 / v5p), else 1 (v5e / v6e single TC)."""
    try:
        kind = jax.devices()[0].device_kind.lower()
    except Exception:
        return 1
    return 2 if any(tag in kind for tag in ("v7", "v4", "v5p")) else 1


def _layernorm(h, true_f, gamma, beta, eps):
    """LayerNorm over the last axis using only the first `true_f` features.

    Requires padded columns of `h` to be exactly zero and padded gamma/beta
    entries to be exactly zero (guaranteed by prepare_actor_params), so the
    one-pass full-lane sums equal the true-feature sums and padded output
    columns stay exactly zero."""
    inv_n = 1.0 / float(true_f)
    # Two independent cross-lane reductions (overlap on the XLU).
    mean = jnp.sum(h, axis=-1, keepdims=True) * inv_n
    mean_sq = jnp.sum(h * h, axis=-1, keepdims=True) * inv_n
    var = mean_sq - mean * mean
    inv = jax.lax.rsqrt(var + eps)  # EUP rsqrt: separate VLIW slot from VALU
    return (h - mean) * inv * gamma + beta


def _actor_kernel(x_ref,
                  w1_ref, p1_ref,
                  w2_ref, p2_ref,
                  w3_ref, b3_ref,
                  o_ref,
                  *, h1_true, h2_true, eps):
    x = x_ref[...]                                            # (TB, S) f32

    # ---- fc1 -> LayerNorm -> ReLU ----------------------------------------
    p1 = p1_ref[...]                                          # (3, H1p): b / gamma / beta
    a = jnp.dot(x.astype(jnp.bfloat16), w1_ref[...],
                preferred_element_type=jnp.float32)
    a = a + p1[0:1]
    a = _layernorm(a, h1_true, p1[1:2], p1[2:3], eps)
    a = jnp.maximum(a, 0.0)

    # ---- fc2 -> LayerNorm -> ReLU ----------------------------------------
    p2 = p2_ref[...]                                          # (3, H2p)
    a = jnp.dot(a.astype(jnp.bfloat16), w2_ref[...],
                preferred_element_type=jnp.float32)
    a = a + p2[0:1]
    a = _layernorm(a, h2_true, p2[1:2], p2[2:3], eps)
    a = jnp.maximum(a, 0.0)

    # ---- mu -> tanh --------------------------------------------------------
    a = jnp.dot(a.astype(jnp.bfloat16), w3_ref[...],
                preferred_element_type=jnp.float32)
    a = a + b3_ref[...]
    o_ref[...] = jnp.tanh(a).astype(o_ref.dtype)


def prepare_actor_params(params):
    """One-time padding / casting of the Actor parameters.

    `params` = (w1, b1, gamma1, beta1, w2, b2, gamma2, beta2, w3, b3), with
    linear weights already transposed to (in_features, out_features) vs.
    PyTorch's (out, in).

    Returns (prepared_arrays, (h1_true, h2_true)).  All padded rows/cols and
    padded bias/gamma/beta entries are EXACTLY ZERO — the kernel's LayerNorm
    depends on this invariant.
    """
    w1, b1, g1, be1, w2, b2, g2, be2, w3, b3 = params
    S, H1 = w1.shape
    H2 = w2.shape[1]
    A = w3.shape[1]
    H1_p = _round_up(H1, 128)
    H2_p = _round_up(H2, 128)

    f32, bf16 = jnp.float32, jnp.bfloat16

    def pad_cols(a, cols):
        a = jnp.asarray(a, f32)
        return jnp.pad(a, ((0, 0), (0, cols - a.shape[1])))

    def pad_rows_cols(a, rows, cols):
        a = jnp.asarray(a, f32)
        return jnp.pad(a, ((0, rows - a.shape[0]), (0, cols - a.shape[1])))

    # Weights cast to bf16 once (matmul operands); small rows stay f32.
    w1_p = pad_cols(w1, H1_p).astype(bf16)                       # (S, H1p)  bf16
    p1_p = pad_cols(jnp.stack([jnp.asarray(b1, f32),
                               jnp.asarray(g1, f32),
                               jnp.asarray(be1, f32)]), H1_p)    # (3, H1p)  f32
    w2_p = pad_rows_cols(w2, H1_p, H2_p).astype(bf16)            # (H1p, H2p) bf16
    p2_p = pad_cols(jnp.stack([jnp.asarray(b2, f32),
                               jnp.asarray(g2, f32),
                               jnp.asarray(be2, f32)]), H2_p)    # (3, H2p)  f32
    w3_p = pad_rows_cols(w3, H2_p, A).astype(bf16)               # (H2p, A)  bf16
    b3_p = jnp.asarray(b3, f32).reshape(1, A)                    # (1, A)    f32

    prepared = (w1_p, p1_p, w2_p, p2_p, w3_p, b3_p)
    return prepared, (H1, H2)


def actor_forward(state, prepared, *, h1_true, h2_true, eps=1e-5,
                  max_tile_b=1024, min_tiles=None):
    """Fused DDPG-Actor forward. `prepared` comes from prepare_actor_params()."""
    w1_p, p1_p, w2_p, p2_p, w3_p, b3_p = prepared
    state = state.astype(jnp.float32)          # no-op when already f32

    B, S = state.shape
    H1_p = w1_p.shape[1]
    H2_p = w2_p.shape[1]
    A = w3_p.shape[1]
    assert w1_p.shape[0] == S, "state feature dim does not match fc1 weights"

    if min_tiles is None:
        min_tiles = _min_batch_tiles()

    # Single big tile on single-TC chips (each extra grid step ~0.35us);
    # >= 2 tiles on multi-TC chips so the "parallel" axis shards the batch.
    if min_tiles > 1 and B >= 16:
        tile_cap = _round_up(pl.cdiv(B, min_tiles), 8)
    else:
        tile_cap = _round_up(B, 8)
    tile_b = max(8, min(max_tile_b, tile_cap))
    B_p = _round_up(B, tile_b)
    if B_p != B:
        state = jnp.pad(state, ((0, B_p - B), (0, 0)))  # tiny batch-row pad only
    grid = (B_p // tile_b,)

    def resident(shape):
        # Parameters stay VMEM-resident across the whole grid (constant block).
        return pl.BlockSpec(shape, lambda i: (0, 0))

    kernel = functools.partial(_actor_kernel, h1_true=h1_true,
                               h2_true=h2_true, eps=eps)

    out = pl.pallas_call(
        kernel,
        out_shape=jax.ShapeDtypeStruct((B_p, A), jnp.float32),
        grid=grid,
        in_specs=[
            # Streamed state tile; last block dim == full array dim (no lane pad).
            pl.BlockSpec((tile_b, S), lambda i: (i, 0)),
            resident((S, H1_p)),       # W1 (bf16)
            resident((3, H1_p)),       # [b1; gamma1; beta1]
            resident((H1_p, H2_p)),    # W2 (bf16)
            resident((3, H2_p)),       # [b2; gamma2; beta2]
            resident((H2_p, A)),       # W_mu (bf16), unpadded action dim
            resident((1, A)),          # b_mu
        ],
        out_specs=pl.BlockSpec((tile_b, A), lambda i: (i, 0)),
        compiler_params=pltpu.CompilerParams(
            dimension_semantics=("parallel",),   # shard batch tiles across TCs
            vmem_limit_bytes=32 * 1024 * 1024,
        ),
    )(state, w1_p, p1_p, w2_p, p2_p, w3_p, b3_p)

    # Strip batch padding only if it was added; action dim is already exact.
    return out[:B] if B_p != B else out


def actor_reference(state, params, eps=1e-5):
    """Pure-JAX reference matching the PyTorch forward (for verification)."""
    w1, b1, g1, be1, w2, b2, g2, be2, w3, b3 = params
    hp = jax.lax.Precision.HIGHEST

    def ln(x, g, b):
        m = jnp.mean(x, axis=-1, keepdims=True)
        v = jnp.mean((x - m) ** 2, axis=-1, keepdims=True)
        return (x - m) / jnp.sqrt(v + eps) * g + b

    h = jax.nn.relu(ln(jnp.dot(state, w1, precision=hp) + b1, g1, be1))
    h = jax.nn.relu(ln(jnp.dot(h, w2, precision=hp) + b2, g2, be2))
    return jnp.tanh(jnp.dot(h, w3, precision=hp) + b3)


# TODO(synk): the Adam optimizer and save/load_checkpoint methods are training
# / file-IO utilities with no kernel equivalent; only the forward pass is
# implemented.

if __name__ == "__main__":
    key = jax.random.PRNGKey(0)
    B, state_dim, action_dim = 64, 24, 4
    hidden1, hidden2 = 256, 256

    ks = jax.random.split(key, 8)
    f1 = 1.0 / np.sqrt(hidden1)
    f2 = 1.0 / np.sqrt(hidden2)
    f3 = 0.003
    params = (
        jax.random.uniform(ks[0], (state_dim, hidden1), jnp.float32, -f1, f1),   # W1 (in,out)
        jax.random.uniform(ks[1], (hidden1,), jnp.float32, -f1, f1),             # b1
        jnp.ones((hidden1,), jnp.float32),                                       # gamma1
        jnp.zeros((hidden1,), jnp.float32),                                      # beta1
        jax.random.uniform(ks[2], (hidden1, hidden2), jnp.float32, -f2, f2),     # W2
        jax.random.uniform(ks[3], (hidden2,), jnp.float32, -f2, f2),             # b2
        jnp.ones((hidden2,), jnp.float32),                                       # gamma2
        jnp.zeros((hidden2,), jnp.float32),                                      # beta2
        jax.random.uniform(ks[4], (hidden2, action_dim), jnp.float32, -f3, f3),  # W_mu
        jax.random.uniform(ks[5], (action_dim,), jnp.float32, -f3, f3),          # b_mu
    )
    state = jax.random.normal(ks[6], (B, state_dim), jnp.float32)

    # One-time parameter preparation (padding / bf16 casts hoisted out of the
    # per-call path), then a jitted forward with the true dims baked in.
    prepared, (h1_true, h2_true) = prepare_actor_params(params)
    fwd = jax.jit(functools.partial(actor_forward,
                                    h1_true=h1_true, h2_true=h2_true))

    actions = jax.block_until_ready(fwd(state, prepared))
    expected = jax.block_until_ready(actor_reference(state, params))

    assert actions.shape == (B, action_dim)
    # bf16 matmul operands with f32 accumulation vs. HIGHEST-precision f32 ref.
    np.testing.assert_allclose(np.asarray(actions), np.asarray(expected),
                               rtol=2e-2, atol=3e-3)
    print("KERNEL_OK")
</pallas_src>

<mosaic_0001>
module attributes {stable_mosaic.version = 11 : i64} {
  func.func @_actor_kernel(%arg0: i32, %arg1: memref<64x24xf32, #tpu.memory_space<vmem>>, %arg2: memref<24x256xbf16, #tpu.memory_space<vmem>>, %arg3: memref<3x256xf32, #tpu.memory_space<vmem>>, %arg4: memref<256x256xbf16, #tpu.memory_space<vmem>>, %arg5: memref<3x256xf32, #tpu.memory_space<vmem>>, %arg6: memref<256x4xbf16, #tpu.memory_space<vmem>>, %arg7: memref<1x4xf32, #tpu.memory_space<vmem>>, %arg8: memref<64x4xf32, #tpu.memory_space<vmem>>) attributes {dimension_semantics = [#tpu.dimension_semantics<parallel>], iteration_bounds = array<i64: 1>, scalar_prefetch = 0 : i64, scratch_operands = 0 : i64, tpu.core_type = #tpu.core_type<tc>, window_params = [{transform_indices = @transform_0, window_bounds = array<i64: 64, 24>}, {pipeline_mode = #tpu.pipeline_mode<synchronous>, transform_indices = @transform_1, window_bounds = array<i64: 24, 256>}, {pipeline_mode = #tpu.pipeline_mode<synchronous>, transform_indices = @transform_2, window_bounds = array<i64: 3, 256>}, {pipeline_mode = #tpu.pipeline_mode<synchronous>, transform_indices = @transform_3, window_bounds = array<i64: 256, 256>}, {pipeline_mode = #tpu.pipeline_mode<synchronous>, transform_indices = @transform_4, window_bounds = array<i64: 3, 256>}, {pipeline_mode = #tpu.pipeline_mode<synchronous>, transform_indices = @transform_5, window_bounds = array<i64: 256, 4>}, {pipeline_mode = #tpu.pipeline_mode<synchronous>, transform_indices = @transform_6, window_bounds = array<i64: 1, 4>}, {transform_indices = @transform_7, window_bounds = array<i64: 64, 4>}]} {
    %c0 = arith.constant 0 : index
    %c0_0 = arith.constant 0 : index
    %0 = vector.load %arg1[%c0, %c0_0] : memref<64x24xf32, #tpu.memory_space<vmem>>, vector<64x24xf32>
    %c0_1 = arith.constant 0 : index
    %c0_2 = arith.constant 0 : index
    %1 = vector.load %arg3[%c0_1, %c0_2] : memref<3x256xf32, #tpu.memory_space<vmem>>, vector<3x256xf32>
    %2 = arith.truncf %0 : vector<64x24xf32> to vector<64x24xbf16>
    %c0_3 = arith.constant 0 : index
    %c0_4 = arith.constant 0 : index
    %3 = vector.load %arg2[%c0_3, %c0_4] : memref<24x256xbf16, #tpu.memory_space<vmem>>, vector<24x256xbf16>
    %cst = arith.constant dense<0.000000e+00> : vector<64x256xf32>
    %4 = tpu.matmul %2, %3, %cst {dimension_numbers = #tpu.dot_dimension_numbers<[1], [0], [0], [1], [0, 0, 1, 1], [], []>} : vector<64x24xbf16>, vector<24x256xbf16>, vector<64x256xf32> -> vector<64x256xf32>
    %5 = vector.extract_strided_slice %1 {offsets = [0, 0], sizes = [1, 256], strides = [1, 1]} : vector<3x256xf32> to vector<1x256xf32>
    %6 = vector.broadcast %5 : vector<1x256xf32> to vector<64x256xf32>
    %7 = arith.addf %4, %6 : vector<64x256xf32>
    %8 = vector.extract_strided_slice %1 {offsets = [1, 0], sizes = [1, 256], strides = [1, 1]} : vector<3x256xf32> to vector<1x256xf32>
    %9 = vector.extract_strided_slice %1 {offsets = [2, 0], sizes = [1, 256], strides = [1, 1]} : vector<3x256xf32> to vector<1x256xf32>
    %cst_5 = arith.constant dense<0.000000e+00> : vector<64xf32>
    %10 = vector.multi_reduction <add>, %7, %cst_5 [1] : vector<64x256xf32> to vector<64xf32>
    %11 = vector.shape_cast %10 : vector<64xf32> to vector<64x1xf32>
    %cst_6 = arith.constant 3.906250e-03 : f32
    %12 = vector.broadcast %cst_6 : f32 to vector<64x1xf32>
    %13 = arith.mulf %11, %12 : vector<64x1xf32>
    %14 = arith.mulf %7, %7 : vector<64x256xf32>
    %cst_7 = arith.constant dense<0.000000e+00> : vector<64xf32>
    %15 = vector.multi_reduction <add>, %14, %cst_7 [1] : vector<64x256xf32> to vector<64xf32>
    %16 = vector.shape_cast %15 : vector<64xf32> to vector<64x1xf32>
    %cst_8 = arith.constant 3.906250e-03 : f32
    %17 = vector.broadcast %cst_8 : f32 to vector<64x1xf32>
    %18 = arith.mulf %16, %17 : vector<64x1xf32>
    %19 = arith.mulf %13, %13 : vector<64x1xf32>
    %20 = arith.subf %18, %19 : vector<64x1xf32>
    %cst_9 = arith.constant 9.99999974E-6 : f32
    %21 = vector.broadcast %cst_9 : f32 to vector<64x1xf32>
    %22 = arith.addf %20, %21 : vector<64x1xf32>
    %23 = math.rsqrt %22 : vector<64x1xf32>
    %24 = vector.broadcast %13 : vector<64x1xf32> to vector<64x256xf32>
    %25 = arith.subf %7, %24 : vector<64x256xf32>
    %26 = vector.broadcast %23 : vector<64x1xf32> to vector<64x256xf32>
    %27 = arith.mulf %25, %26 : vector<64x256xf32>
    %28 = vector.broadcast %8 : vector<1x256xf32> to vector<64x256xf32>
    %29 = arith.mulf %27, %28 : vector<64x256xf32>
    %30 = vector.broadcast %9 : vector<1x256xf32> to vector<64x256xf32>
    %31 = arith.addf %29, %30 : vector<64x256xf32>
    %cst_10 = arith.constant 0.000000e+00 : f32
    %32 = vector.broadcast %cst_10 : f32 to vector<64x256xf32>
    %33 = arith.maximumf %31, %32 : vector<64x256xf32>
    %c0_11 = arith.constant 0 : index
    %c0_12 = arith.constant 0 : index
    %34 = vector.load %arg5[%c0_11, %c0_12] : memref<3x256xf32, #tpu.memory_space<vmem>>, vector<3x256xf32>
    %35 = arith.truncf %33 : vector<64x256xf32> to vector<64x256xbf16>
    %c0_13 = arith.constant 0 : index
    %c0_14 = arith.constant 0 : index
    %36 = vector.load %arg4[%c0_13, %c0_14] : memref<256x256xbf16, #tpu.memory_space<vmem>>, vector<256x256xbf16>
    %cst_15 = arith.constant dense<0.000000e+00> : vector<64x256xf32>
    %37 = tpu.matmul %35, %36, %cst_15 {dimension_numbers = #tpu.dot_dimension_numbers<[1], [0], [0], [1], [0, 0, 1, 1], [], []>} : vector<64x256xbf16>, vector<256x256xbf16>, vector<64x256xf32> -> vector<64x256xf32>
    %38 = vector.extract_strided_slice %34 {offsets = [0, 0], sizes = [1, 256], strides = [1, 1]} : vector<3x256xf32> to vector<1x256xf32>
    %39 = vector.broadcast %38 : vector<1x256xf32> to vector<64x256xf32>
    %40 = arith.addf %37, %39 : vector<64x256xf32>
    %41 = vector.extract_strided_slice %34 {offsets = [1, 0], sizes = [1, 256], strides = [1, 1]} : vector<3x256xf32> to vector<1x256xf32>
    %42 = vector.extract_strided_slice %34 {offsets = [2, 0], sizes = [1, 256], strides = [1, 1]} : vector<3x256xf32> to vector<1x256xf32>
    %cst_16 = arith.constant dense<0.000000e+00> : vector<64xf32>
    %43 = vector.multi_reduction <add>, %40, %cst_16 [1] : vector<64x256xf32> to vector<64xf32>
    %44 = vector.shape_cast %43 : vector<64xf32> to vector<64x1xf32>
    %cst_17 = arith.constant 3.906250e-03 : f32
    %45 = vector.broadcast %cst_17 : f32 to vector<64x1xf32>
    %46 = arith.mulf %44, %45 : vector<64x1xf32>
    %47 = arith.mulf %40, %40 : vector<64x256xf32>
    %cst_18 = arith.constant dense<0.000000e+00> : vector<64xf32>
    %48 = vector.multi_reduction <add>, %47, %cst_18 [1] : vector<64x256xf32> to vector<64xf32>
    %49 = vector.shape_cast %48 : vector<64xf32> to vector<64x1xf32>
    %cst_19 = arith.constant 3.906250e-03 : f32
    %50 = vector.broadcast %cst_19 : f32 to vector<64x1xf32>
    %51 = arith.mulf %49, %50 : vector<64x1xf32>
    %52 = arith.mulf %46, %46 : vector<64x1xf32>
    %53 = arith.subf %51, %52 : vector<64x1xf32>
    %cst_20 = arith.constant 9.99999974E-6 : f32
    %54 = vector.broadcast %cst_20 : f32 to vector<64x1xf32>
    %55 = arith.addf %53, %54 : vector<64x1xf32>
    %56 = math.rsqrt %55 : vector<64x1xf32>
    %57 = vector.broadcast %46 : vector<64x1xf32> to vector<64x256xf32>
    %58 = arith.subf %40, %57 : vector<64x256xf32>
    %59 = vector.broadcast %56 : vector<64x1xf32> to vector<64x256xf32>
    %60 = arith.mulf %58, %59 : vector<64x256xf32>
    %61 = vector.broadcast %41 : vector<1x256xf32> to vector<64x256xf32>
    %62 = arith.mulf %60, %61 : vector<64x256xf32>
    %63 = vector.broadcast %42 : vector<1x256xf32> to vector<64x256xf32>
    %64 = arith.addf %62, %63 : vector<64x256xf32>
    %cst_21 = arith.constant 0.000000e+00 : f32
    %65 = vector.broadcast %cst_21 : f32 to vector<64x256xf32>
    %66 = arith.maximumf %64, %65 : vector<64x256xf32>
    %67 = arith.truncf %66 : vector<64x256xf32> to vector<64x256xbf16>
    %c0_22 = arith.constant 0 : index
    %c0_23 = arith.constant 0 : index
    %68 = vector.load %arg6[%c0_22, %c0_23] : memref<256x4xbf16, #tpu.memory_space<vmem>>, vector<256x4xbf16>
    %cst_24 = arith.constant dense<0.000000e+00> : vector<64x4xf32>
    %69 = tpu.matmul %67, %68, %cst_24 {dimension_numbers = #tpu.dot_dimension_numbers<[1], [0], [0], [1], [0, 0, 1, 1], [], []>} : vector<64x256xbf16>, vector<256x4xbf16>, vector<64x4xf32> -> vector<64x4xf32>
    %c0_25 = arith.constant 0 : index
    %c0_26 = arith.constant 0 : index
    %70 = vector.load %arg7[%c0_25, %c0_26] : memref<1x4xf32, #tpu.memory_space<vmem>>, vector<1x4xf32>
    %71 = vector.broadcast %70 : vector<1x4xf32> to vector<64x4xf32>
    %72 = arith.addf %69, %71 : vector<64x4xf32>
    %73 = math.tanh %72 : vector<64x4xf32>
    %c0_27 = arith.constant 0 : index
    %c0_28 = arith.constant 0 : index
    %74 = vector.load %arg8[%c0_27, %c0_28] : memref<64x4xf32, #tpu.memory_space<vmem>>, vector<64x4xf32>
    tpu.vector_store %arg8[%c0_27, %c0_28], %73 {strides = array<i32>} : memref<64x4xf32, #tpu.memory_space<vmem>>, vector<64x4xf32>,
    return
  }
  func.func @transform_0(%arg0: i32) -> (i32, i32) {
    %c0_i32 = arith.constant 0 : i32
    %c0_i32_0 = arith.constant 0 : i32
    return %arg0, %c0_i32 : i32, i32
  }
  func.func @transform_1(%arg0: i32) -> (i32, i32) {
    %c0_i32 = arith.constant 0 : i32
    %c0_i32_0 = arith.constant 0 : i32
    %c0_i32_1 = arith.constant 0 : i32
    return %c0_i32, %c0_i32_0 : i32, i32
  }
  func.func @transform_2(%arg0: i32) -> (i32, i32) {
    %c0_i32 = arith.constant 0 : i32
    %c0_i32_0 = arith.constant 0 : i32
    %c0_i32_1 = arith.constant 0 : i32
    return %c0_i32, %c0_i32_0 : i32, i32
  }
  func.func @transform_3(%arg0: i32) -> (i32, i32) {
    %c0_i32 = arith.constant 0 : i32
    %c0_i32_0 = arith.constant 0 : i32
    %c0_i32_1 = arith.constant 0 : i32
    return %c0_i32, %c0_i32_0 : i32, i32
  }
  func.func @transform_4(%arg0: i32) -> (i32, i32) {
    %c0_i32 = arith.constant 0 : i32
    %c0_i32_0 = arith.constant 0 : i32
    %c0_i32_1 = arith.constant 0 : i32
    return %c0_i32, %c0_i32_0 : i32, i32
  }
  func.func @transform_5(%arg0: i32) -> (i32, i32) {
    %c0_i32 = arith.constant 0 : i32
    %c0_i32_0 = arith.constant 0 : i32
    %c0_i32_1 = arith.constant 0 : i32
    return %c0_i32, %c0_i32_0 : i32, i32
  }
  func.func @transform_6(%arg0: i32) -> (i32, i32) {
    %c0_i32 = arith.constant 0 : i32
    %c0_i32_0 = arith.constant 0 : i32
    %c0_i32_1 = arith.constant 0 : i32
    return %c0_i32, %c0_i32_0 : i32, i32
  }
  func.func @transform_7(%arg0: i32) -> (i32, i32) {
    %c0_i32 = arith.constant 0 : i32
    %c0_i32_0 = arith.constant 0 : i32
    return %arg0, %c0_i32 : i32, i32
  }
}

</mosaic_0001>

<bundles_post_ra>
// kernel: actor_forward.1
= control target key start
LH: loop header
LB: loop body
LE: loop exit
PB: predicated region body
PF: predicated region fallthrough
CT: control target
= control target key end

     0   :  { %12 = vsyncpa [#allocation3], 0  ;;  %s1404_s24 = smov [#allocation2]   ;;  %s2033_s0 = inlined_call_operand.vmem [shape: f32[64,24], index: 0, kind: input, shape index: {}]   ;;  %s2034_s1 = inlined_call_operand.vmem [shape: bf16[24,256], index: 1, kind: input, shape index: {}]   ;;  %s2035_s2 = inlined_call_operand.vmem [shape: f32[3,256], index: 2, kind: input, shape index: {}]   ;;  %s2036_s3 = inlined_call_operand.hbm [shape: bf16[256,256], index: 3, kind: input, shape index: {}]   ;;  %s2037_s4 = inlined_call_operand.vmem [shape: f32[3,256], index: 4, kind: input, shape index: {}]   ;;  %s2038_s5 = inlined_call_operand.vmem [shape: bf16[256,4], index: 5, kind: input, shape index: {}]   ;;  %s2039_s6 = inlined_call_operand.vmem [shape: f32[1,4], index: 6, kind: input, shape index: {}]   ;;  %s2040_s7 = inlined_call_operand.vmem [shape: f32[64,4], index: 7, kind: output, shape index: {}]  }
   0x1   :  { %s24_s25 = sshll.u32 %s1404_s24, 4  ;;  %s25_s25 = int_to_ptr.vmem [resolvable:$true] %s24_s25 }
   0x2   :  { %s1390_s26 = scalar_lea.vmem %s25_s25, 4096  ;;  %p1395_p1 = scmp.lt.s32.totalorder %s25_s25, %s25_s25 }
   0x3   :  { %p1391_p0 = scmp.ne.s32.totalorder %s25_s25, %s1390_s26  ;;  %p1396_p2 = scmp.lt.s32.totalorder %s1390_s26, %s1390_s26 }
   0x5   :  { %p1397_p3 = por %p1396_p2, %p1395_p1 }
   0x7   :  { %p1398_p4 = pnand %p1397_p3, %p1391_p0 }
   0x9   :  { %1401 = shalt.err (!%p1398_p4)
}
   0xa   :  { %s1405_s27 = smov 128   ;;  %s1406_s28 = smov 8  }
   0xb   :  { %30 = dma.hbm_to_vmem [thread:$0]  %s2036_s3, 4096, %s25_s25, [#allocation3], %s1405_s27, %s1405_s27, %s1406_s28  }
   0xc   :  { %1402 = dma.done.wait [#allocation3], 4096  }
   0xd   :  { %1403 = vsyncadd [#allocation3], 4294963200  ;;  %v1407_v0 = vmov 0   ;;  %v56_v1 = vld [vmem:[%s2034_s1 + $0x10] sm:$0xff]  ;;  %vm104_vm0 = vcmask 1043456   ;;  %v41_v7 = vld [vmem:[%s2033_s0] sm:$0xff]  ;;  %v58_v33 = vlaneseq }
   0xe   :  { %143 = vmatprep.mubr.bf16.mxu0 %v1407_v0  ;;  %v1166_v2 = vcombine.high %v56_v1, %v56_v1  ;;  %v1165_v3 = vcombine.low %v56_v1, %v56_v1  ;;  %v1267_v4 = vld [vmem:[%s2034_s1 + $0x4] ss:$8 sps:$4 sm:$0xff]   ;;  %v1269_v6 = vld [vmem:[%s2034_s1] ss:$8 sps:$4 sm:$0xff]   ;;  %vm91_vm1 = vcmask 195584   ;;  %v43_v10 = vld [vmem:[%s2033_s0 + $0x10] sm:$0xff] }
   0xf   :  { %v42_v8 = vld [vmem:[%s2033_s0 + $0x8] sm:$0xff]  ;;  %v44_v11 = vld [vmem:[%s2033_s0 + $0x18] sm:$0xff]  ;;  %v45_v13 = vld [vmem:[%s2033_s0 + $0x20] sm:$0xff]  ;;  %v1488_v34 = vshrl.u32 %v58_v33, 7  ;;  %vm1149_vm2 = vcmask 31744  }
  0x10   :  { %1167 = vmatprep.subr.msk.bf16.mxu0 %vm104_vm0, %v1166_v2  ;;  %v106_v5 = vsel %vm104_vm0, %v1165_v3, 0  ;;  %v50_v9 = vpack.c.bf16 %v42_v8, %v41_v7  ;;  %v51_v12 = vpack.c.bf16 %v44_v11, %v43_v10  ;;  %v46_v14 = vld [vmem:[%s2033_s0 + $0x28] sm:$0xff]  ;;  %v47_v16 = vld [vmem:[%s2033_s0 + $0x30] sm:$0xff]  ;;  %v48_v17 = vld [vmem:[%s2033_s0 + $0x38] sm:$0xff] }
  0x11   :  { %124 = vmatpush1.bf16.msra.mxu0 %v106_v5  ;;  %v52_v15 = vpack.c.bf16 %v46_v14, %v45_v13  ;;  %v53_v18 = vpack.c.bf16 %v48_v17, %v47_v16  ;;  %v1270_v19 = vld [vmem:[#allocation2 + $0x74] ss:$8 sps:$4 sm:$0xff]   ;;  %v1272_v20 = vld [vmem:[#allocation2 + $0x70] ss:$8 sps:$4 sm:$0xff]   ;;  %v1273_v21 = vld [vmem:[#allocation2 + $0x64] ss:$8 sps:$4 sm:$0xff]  }
  0x12   :  { %125 = vmatprep.subr.bf16.mxu0 %v1267_v4  ;;  %632 = vmatprep.subr.bf16.mxu1 %v1270_v19  ;;  %v1275_v22 = vld [vmem:[#allocation2 + $0x60] ss:$8 sps:$4 sm:$0xff]   ;;  %v1276_v23 = vld [vmem:[#allocation2 + $0x54] ss:$8 sps:$4 sm:$0xff]   ;;  %v1278_v24 = vld [vmem:[#allocation2 + $0x50] ss:$8 sps:$4 sm:$0xff]  }
  0x13   :  { %633 = vmatpush1.bf16.msra.mxu1 %v1272_v20  ;;  %v1279_v25 = vld [vmem:[#allocation2 + $0x44] ss:$8 sps:$4 sm:$0xff]   ;;  %v1281_v26 = vld [vmem:[#allocation2 + $0x40] ss:$8 sps:$4 sm:$0xff]   ;;  %v1282_v27 = vld [vmem:[#allocation2 + $0x34] ss:$8 sps:$4 sm:$0xff]  }
  0x14   :  { %634 = vmatprep.subr.bf16.mxu1 %v1273_v21  ;;  %v1284_v28 = vld [vmem:[#allocation2 + $0x30] ss:$8 sps:$4 sm:$0xff]   ;;  %v1285_v29 = vld [vmem:[#allocation2 + $0x24] ss:$8 sps:$4 sm:$0xff]   ;;  %v1287_v30 = vld [vmem:[#allocation2 + $0x20] ss:$8 sps:$4 sm:$0xff]  }
  0x15   :  { %126 = vmatpush1.bf16.msra.mxu0 %v1269_v6  ;;  %v1288_v31 = vld [vmem:[#allocation2 + $0x14] ss:$8 sps:$4 sm:$0xff]   ;;  %v1290_v32 = vld [vmem:[#allocation2 + $0x10] ss:$8 sps:$4 sm:$0xff]   ;;  %v1491_v35 = vsub.s32 0, %v1488_v34  ;;  %v64_v37 = vsub.s32 4, %v1488_v34 }
  0x16   :  { %v1496_v36 = vld [vmem:[%s2035_s2] sm:$0x77]  ;;  %v1294_v16 = vld [vmem:[#allocation2 + $0xf4] ss:$8 sps:$4 sm:$0xff]   ;;  %v1296_v21 = vld [vmem:[#allocation2 + $0xf0] ss:$8 sps:$4 sm:$0xff]  }
  0x17   :  { %635 = vmatpush1.bf16.msra.mxu1 %v1275_v22  ;;  %v61_v38 = vrot.slane %v1496_v36, %v1491_v35  ;;  %v65_v39 = vrot.slane %v1496_v36, %v64_v37  ;;  %v1291_v6 = vld [vmem:[#allocation2 + $0x4] ss:$8 sps:$4 sm:$0xff]   ;;  %v1293_v10 = vld [vmem:[#allocation2] ss:$8 sps:$4 sm:$0xff]  }
  0x18   :  { %1168 = vmatmul.mubr.msk.bf16.vlgmr.msra.gmra.mxu0 %vm91_vm1, %v50_v9  ;;  %636 = vmatprep.subr.bf16.mxu1 %v1276_v23 }
  0x19   :  { %153 = vmatprep.mubr.bf16.mxu0 %v1407_v0  ;;  %v1505_v40 = vrot.slane %v61_v38, %v1491_v35  ;;  %v1508_v41 = vrot.slane %v65_v39, %v1491_v35 }
  0x1b   :  { %637 = vmatpush1.bf16.msra.mxu1 %v1278_v24 }
  0x1c   :  { %638 = vmatprep.subr.bf16.mxu1 %v1279_v25 }
  0x1f   :  { %639 = vmatpush1.bf16.msra.mxu1 %v1281_v26 }
  0x20   :  { %1169 = vmatmul.mubr.msk.bf16.gmra.mxu0 %vm91_vm1, %v51_v12  ;;  %640 = vmatprep.subr.bf16.mxu1 %v1282_v27 }
  0x21   :  { %163 = vmatprep.mubr.bf16.mxu0 %v1407_v0 }
  0x23   :  { %641 = vmatpush1.bf16.msra.mxu1 %v1284_v28 }
  0x24   :  { %642 = vmatprep.subr.bf16.mxu1 %v1285_v29  ;;  %v1297_v29 = vld [vmem:[#allocation2 + $0xe4] ss:$8 sps:$4 sm:$0xff]  }
  0x27   :  { %643 = vmatpush1.bf16.msra.mxu1 %v1287_v30 }
  0x28   :  { %1170 = vmatmul.mubr.msk.bf16.gmra.mxu0 %vm91_vm1, %v52_v15  ;;  %644 = vmatprep.subr.bf16.mxu1 %v1288_v31  ;;  %v1299_v31 = vld [vmem:[#allocation2 + $0xe0] ss:$8 sps:$4 sm:$0xff]  }
  0x29   :  { %173 = vmatprep.mubr.bf16.mxu0 %v1407_v0 }
  0x2b   :  { %645 = vmatpush1.bf16.msra.mxu1 %v1290_v32 }
  0x2c   :  { %646 = vmatprep.subr.bf16.mxu1 %v1291_v6  ;;  %v1315_v6 = vld [vmem:[#allocation2 + $0x84] ss:$8 sps:$4 sm:$0xff]  }
  0x2f   :  { %647 = vmatpush1.bf16.msra.mxu1 %v1293_v10 }
  0x30   :  { %1171 = vmatmul.mubr.msk.bf16.gmra.mxu0 %vm91_vm1, %v53_v18  ;;  %648 = vmatprep.subr.bf16.mxu1 %v1294_v16 }
  0x33   :  { %649 = vmatpush2.bf16.msra.mxu1 %v1296_v21 }
  0x34   :  { %650 = vmatprep.subr.bf16.mxu1 %v1297_v29 }
  0x37   :  { %651 = vmatpush2.bf16.msra.mxu1 %v1299_v31 }
  0xd8   :  { %v145_v42 = vpop.f32.mrf.mxu0 }
  0xd9   :  { %v1511_v43 = vadd.f32 %v145_v42, %v1505_v40 }
  0xda   :  { %v147_v44 = vpop.f32.mrf.mxu0 }
  0xdb   :  { %v1514_v45 = vadd.f32 %v147_v44, %v1508_v41  ;;  %v216_v49 = vmul.f32 %v1511_v43, %v1511_v43 }
  0xdc   :  { %v149_v46 = vpop.f32.mrf.mxu0 }
  0xdd   :  { %v1517_v47 = vadd.f32 %v149_v46, %v1505_v40  ;;  %v184_v48 = vadd.f32 %v1514_v45, %v1511_v43  ;;  %v217_v50 = vmul.f32 %v1514_v45, %v1514_v45 }
  0xde   :  { %v151_v51 = vpop.f32.mrf.mxu0 }
  0xdf   :  { %v1526_v52 = vadd.f32 %v151_v51, %v1508_v41  ;;  %185 = vadd.xlane.f32.xlu0 %v184_v48  ;;  %v232_v53 = vadd.f32 %v217_v50, %v216_v49  ;;  %v218_v56 = vmul.f32 %v1517_v47, %v1517_v47  ;;  %v1300_v48 = vld [vmem:[#allocation2 + $0xd4] ss:$8 sps:$4 sm:$0xff]   ;;  %v1302_v50 = vld [vmem:[#allocation2 + $0xd0] ss:$8 sps:$4 sm:$0xff]  }
  0xe0   :  { %v155_v54 = vpop.f32.mrf.mxu0  ;;  %652 = vmatprep.subr.bf16.mxu1 %v1300_v48 }
  0xe1   :  { %233 = vadd.xlane.f32.xlu1 %v232_v53  ;;  %v187_v55 = vadd.f32 %v1526_v52, %v1517_v47  ;;  %v219_v57 = vmul.f32 %v1526_v52, %v1526_v52  ;;  %v1535_v59 = vadd.f32 %v155_v54, %v1505_v40  ;;  %653 = vmatpush2.bf16.msra.mxu1 %v1302_v50  ;;  %v368_v50 = vsub.s32 6, %v1488_v34 }
  0xe2   :  { %v157_v58 = vpop.f32.mrf.mxu0 }
  0xe3   :  { %v1538_v60 = vadd.f32 %v157_v58, %v1508_v41  ;;  %188 = vadd.xlane.f32.xlu0 %v187_v55  ;;  %v235_v61 = vadd.f32 %v219_v57, %v218_v56  ;;  %v220_v4 = vmul.f32 %v1535_v59, %v1535_v59  ;;  %v1303_v58 = vld [vmem:[#allocation2 + $0xc4] ss:$8 sps:$4 sm:$0xff]  }
  0xe4   :  { %v159_v62 = vpop.f32.mrf.mxu0  ;;  %654 = vmatprep.subr.bf16.mxu1 %v1303_v58 }
  0xe5   :  { %236 = vadd.xlane.f32.xlu1 %v235_v61  ;;  %v190_v63 = vadd.f32 %v1538_v60, %v1535_v59  ;;  %v221_v0 = vmul.f32 %v1538_v60, %v1538_v60  ;;  %v1545_v2 = vadd.f32 %v159_v62, %v1505_v40  ;;  %v1306_v62 = vld [vmem:[#allocation2 + $0xb4] ss:$8 sps:$4 sm:$0xff]  }
  0xe6   :  { %v161_v1 = vpop.f32.mrf.mxu0 }
  0xe7   :  { %v1548_v3 = vadd.f32 %v161_v1, %v1508_v41  ;;  %191 = vadd.xlane.f32.xlu0 %v190_v63  ;;  %v238_v8 = vadd.f32 %v221_v0, %v220_v4  ;;  %v222_v14 = vmul.f32 %v1545_v2, %v1545_v2  ;;  %v1308_v63 = vld [vmem:[#allocation2 + $0xb0] ss:$8 sps:$4 sm:$0xff]   ;;  %v1309_v0 = vld [vmem:[#allocation2 + $0xa4] ss:$8 sps:$4 sm:$0xff]   ;;  %v1311_v1 = vld [vmem:[#allocation2 + $0xa0] ss:$8 sps:$4 sm:$0xff]  }
  0xe8   :  { %v165_v5 = vpop.f32.mrf.mxu0  ;;  %v1312_v4 = vld [vmem:[#allocation2 + $0x94] ss:$8 sps:$4 sm:$0xff]  }
  0xe9   :  { %v193_v7 = vadd.f32 %v1548_v3, %v1545_v2  ;;  %v223_v9 = vmul.f32 %v1548_v3, %v1548_v3  ;;  %v1557_v12 = vadd.f32 %v165_v5, %v1505_v40  ;;  %v1314_v5 = vld [vmem:[#allocation2 + $0x90] ss:$8 sps:$4 sm:$0xff]  }
  0xea   :  { %v167_v11 = vpop.f32.mrf.mxu0 }
  0xeb   :  { %v1560_v13 = vadd.f32 %v167_v11, %v1508_v41  ;;  %194 = vadd.xlane.f32.xlu1 %v193_v7  ;;  %239 = vadd.xlane.f32.xlu0 %v238_v8  ;;  %v241_v17 = vadd.f32 %v223_v9, %v222_v14  ;;  %v224_v24 = vmul.f32 %v1557_v12, %v1557_v12  ;;  %v1317_v7 = vld [vmem:[#allocation2 + $0x80] ss:$8 sps:$4 sm:$0xff]  }
  0xec   :  { %v169_v15 = vpop.f32.mrf.mxu0 }
  0xed   :  { %v196_v18 = vadd.f32 %v1560_v13, %v1557_v12  ;;  %v225_v19 = vmul.f32 %v1560_v13, %v1560_v13  ;;  %v1569_v22 = vadd.f32 %v169_v15, %v1505_v40 }
  0xee   :  { %v171_v20 = vpop.f32.mrf.mxu0 }
  0xef   :  { %v1572_v23 = vadd.f32 %v171_v20, %v1508_v41  ;;  %242 = vadd.xlane.f32.xlu1 %v241_v17  ;;  %197 = vadd.xlane.f32.xlu0 %v196_v18  ;;  %v244_v27 = vadd.f32 %v225_v19, %v224_v24  ;;  %v226_v38 = vmul.f32 %v1569_v22, %v1569_v22 }
  0xf0   :  { %v175_v25 = vpop.f32.mrf.mxu0 }
  0xf1   :  { %v199_v26 = vadd.f32 %v1572_v23, %v1569_v22  ;;  %v227_v28 = vmul.f32 %v1572_v23, %v1572_v23  ;;  %v1581_v32 = vadd.f32 %v175_v25, %v1505_v40 }
  0xf2   :  { %v177_v30 = vpop.f32.mrf.mxu0 }
  0xf3   :  { %v1584_v33 = vadd.f32 %v177_v30, %v1508_v41  ;;  %200 = vadd.xlane.f32.xlu1 %v199_v26  ;;  %245 = vadd.xlane.f32.xlu0 %v244_v27  ;;  %v247_v42 = vadd.f32 %v227_v28, %v226_v38  ;;  %v228_v54 = vmul.f32 %v1581_v32, %v1581_v32 }
  0xf4   :  { %v179_v39 = vpop.f32.mrf.mxu0 }
  0xf5   :  { %v202_v44 = vadd.f32 %v1584_v33, %v1581_v32  ;;  %v229_v46 = vmul.f32 %v1584_v33, %v1584_v33  ;;  %v1593_v51 = vadd.f32 %v179_v39, %v1505_v40  ;;  %v1305_v40 = vld [vmem:[#allocation2 + $0xc0] ss:$8 sps:$4 sm:$0xff]   ;;  %v1617_v39 = vsub.s32 1, %v1488_v34 }
  0xf6   :  { %v181_v49 = vpop.f32.mrf.mxu0  ;;  %655 = vmatpush2.bf16.msra.mxu1 %v1305_v40 }
  0xf7   :  { %v1596_v53 = vadd.f32 %v181_v49, %v1508_v41  ;;  %248 = vadd.xlane.f32.xlu1 %v247_v42  ;;  %203 = vadd.xlane.f32.xlu0 %v202_v44  ;;  %v250_v56 = vadd.f32 %v229_v46, %v228_v54  ;;  %v230_v41 = vmul.f32 %v1593_v51, %v1593_v51  ;;  %v334_v42 = vsub.s32 5, %v1488_v34 }
  0xf8   :  { %656 = vmatprep.subr.bf16.mxu1 %v1306_v62  ;;  %v1621_v49 = vsub.s32 2, %v1488_v34  ;;  %v331_v40 = vrot.slane %v1496_v36, %v1617_v39 }
  0xf9   :  { %v205_v55 = vadd.f32 %v1596_v53, %v1593_v51  ;;  %v231_v57 = vmul.f32 %v1596_v53, %v1596_v53  ;;  %v335_v58 = vrot.slane %v1496_v36, %v334_v42 }
  0xfa   :  { %657 = vmatpush2.bf16.msra.mxu1 %v1308_v63  ;;  %v369_v63 = vrot.slane %v1496_v36, %v368_v50 }
  0xfb   :  { %206 = vadd.xlane.f32.xlu1 %v205_v55  ;;  %251 = vadd.xlane.f32.xlu0 %v250_v56  ;;  %v253_v61 = vadd.f32 %v231_v57, %v230_v41 }
  0xfc   :  { %658 = vmatprep.subr.bf16.mxu1 %v1309_v0  ;;  %v365_v0 = vrot.slane %v1496_v36, %v1621_v49 }
  0xfe   :  { %659 = vmatpush2.bf16.msra.mxu1 %v1311_v1 }
  0xff   :  { %254 = vadd.xlane.f32.xlu1 %v253_v61  ;;  %660 = vmatprep.subr.bf16.mxu1 %v1312_v4 }
 0x102   :  { %661 = vmatpush2.bf16.msra.mxu1 %v1314_v5 }
 0x103   :  { %662 = vmatprep.subr.bf16.mxu1 %v1315_v6 }
 0x106   :  { %663 = vmatpush2.bf16.msra.mxu1 %v1317_v7 }
 0x168   :  { %v186_v8 = vpop.xlane.xlu0 %185 }
 0x169   :  { %v208_v9 = vmul.f32 0.00390625, %v186_v8 }
 0x16a   :  { %v234_v10 = vpop.xlane.xlu1 %233 }
 0x16b   :  { %v256_v11 = vmul.f32 0.00390625, %v234_v10  ;;  %v264_v14 = vmul.f32 %v208_v9, %v208_v9  ;;  %v296_v8 = vsub.f32 %v1511_v43, %v208_v9  ;;  %v297_v10 = vsub.f32 %v1514_v45, %v208_v9 }
 0x16c   :  { %v189_v15 = vpop.xlane.xlu0 %188 }
 0x16d   :  { %v272_v16 = vsub.f32 %v256_v11, %v264_v14  ;;  %v1606_v17 = vmul.f32 0.00390625, %v189_v15  ;;  %v1645_v11 = vrot.slane %v335_v58, %v1617_v39  ;;  %v1648_v14 = vrot.slane %v331_v40, %v1617_v39 }
 0x16e   :  { %v237_v18 = vpop.xlane.xlu1 %236 }
 0x16f   :  { %v280_v19 = vadd.f32 1e-05, %v272_v16  ;;  %v257_v20 = vmul.f32 0.00390625, %v237_v18  ;;  %v265_v21 = vmul.f32 %v1606_v17, %v1606_v17 }
 0x170   :  { %v192_v24 = vpop.xlane.xlu0 %191 }
 0x171   :  { %1334 = vrsqrt.f32 %v280_v19  ;;  %v1610_v25 = vmul.f32 0.00390625, %v192_v24  ;;  %v273_v26 = vsub.f32 %v257_v20, %v265_v21  ;;  %v1651_v19 = vrot.slane %v369_v63, %v1621_v49 }
 0x172   :  { %v1654_v21 = vrot.slane %v365_v0, %v1621_v49 }
 0x173   :  { %v281_v27 = vadd.f32 1e-05, %v273_v26  ;;  %v266_v31 = vmul.f32 %v1610_v25, %v1610_v25  ;;  %v298_v26 = vsub.f32 %v1517_v47, %v1606_v17 }
 0x174   :  { %v195_v28 = vpop.xlane.xlu1 %194  ;;  %v240_v29 = vpop.xlane.xlu0 %239 }
 0x175   :  { %v1612_v30 = vmul.f32 0.00390625, %v195_v28  ;;  %v258_v38 = vmul.f32 0.00390625, %v240_v29  ;;  %1336 = vrsqrt.f32 %v281_v27  ;;  %v299_v27 = vsub.f32 %v1526_v52, %v1606_v17 }
 0x177   :  { %v274_v44 = vsub.f32 %v258_v38, %v266_v31  ;;  %v267_v55 = vmul.f32 %v1612_v30, %v1612_v30 }
 0x178   :  { %v243_v46 = vpop.xlane.xlu1 %242  ;;  %v198_v48 = vpop.xlane.xlu0 %197 }
 0x179   :  { %v282_v54 = vadd.f32 1e-05, %v274_v44  ;;  %v259_v56 = vmul.f32 0.00390625, %v243_v46  ;;  %v1626_v57 = vmul.f32 0.00390625, %v198_v48  ;;  %v300_v44 = vsub.f32 %v1535_v59, %v1610_v25 }
 0x17a   :  { %v301_v59 = vsub.f32 %v1538_v60, %v1610_v25 }
 0x17b   :  { %1338 = vrsqrt.f32 %v282_v54  ;;  %v275_v41 = vsub.f32 %v259_v56, %v267_v55  ;;  %v268_v5 = vmul.f32 %v1626_v57, %v1626_v57 }
 0x17c   :  { %v201_v61 = vpop.xlane.xlu1 %200  ;;  %v246_v62 = vpop.xlane.xlu0 %245 }
 0x17d   :  { %v283_v1 = vadd.f32 1e-05, %v275_v41  ;;  %v1638_v4 = vmul.f32 0.00390625, %v201_v61  ;;  %v260_v6 = vmul.f32 0.00390625, %v246_v62  ;;  %v302_v62 = vsub.f32 %v1545_v2, %v1612_v30 }
 0x17e   :  { %v1335_v7 = vpop.eup %1334 }
 0x17f   :  { %1340 = vrsqrt.f32 %v283_v1  ;;  %v276_v36 = vsub.f32 %v260_v6, %v268_v5  ;;  %v313_v18 = vmul.f32 %v1335_v7, %v297_v10  ;;  %v312_v20 = vmul.f32 %v1335_v7, %v296_v8 }
 0x180   :  { %v249_v15 = vpop.xlane.xlu1 %248  ;;  %v204_v16 = vpop.xlane.xlu0 %203  ;;  %v269_v45 = vmul.f32 %v1638_v4, %v1638_v4  ;;  %v303_v1 = vsub.f32 %v1548_v3, %v1612_v30 }
 0x181   :  { %v284_v43 = vadd.f32 1e-05, %v276_v36  ;;  %v261_v9 = vmul.f32 0.00390625, %v249_v15  ;;  %v1658_v24 = vmul.f32 0.00390625, %v204_v16  ;;  %v347_v28 = vmul.f32 %v1645_v11, %v313_v18 }
 0x182   :  { %v346_v29 = vmul.f32 %v1648_v14, %v312_v20  ;;  %v1337_v31 = vpop.eup %1336 }
 0x183   :  { %1342 = vrsqrt.f32 %v284_v43  ;;  %v277_v38 = vsub.f32 %v261_v9, %v269_v45  ;;  %v315_v54 = vmul.f32 %v1337_v31, %v299_v27  ;;  %v314_v55 = vmul.f32 %v1337_v31, %v298_v26 }
 0x184   :  { %v207_v46 = vpop.xlane.xlu1 %206  ;;  %v252_v48 = vpop.xlane.xlu0 %251  ;;  %v270_v47 = vmul.f32 %v1658_v24, %v1658_v24  ;;  %v381_v40 = vadd.f32 %v1651_v19, %v347_v28  ;;  %v380_v61 = vadd.f32 %v1654_v21, %v346_v29  ;;  %v304_v29 = vsub.f32 %v1557_v12, %v1626_v57 }
 0x185   :  { %v285_v56 = vadd.f32 1e-05, %v277_v38  ;;  %v1668_v58 = vmul.f32 0.00390625, %v207_v46  ;;  %v262_v52 = vmul.f32 0.00390625, %v252_v48  ;;  %v349_v17 = vmul.f32 %v1645_v11, %v315_v54 }
 0x186   :  { %v348_v41 = vmul.f32 %v1648_v14, %v314_v55  ;;  %v397_v15 = vmax.f32 %v381_v40, 0.0  ;;  %v396_v16 = vmax.f32 %v380_v61, 0.0  ;;  %v305_v31 = vsub.f32 %v1560_v13, %v1626_v57 }
 0x187   :  { %1344 = vrsqrt.f32 %v285_v56  ;;  %v278_v63 = vsub.f32 %v262_v52, %v270_v47  ;;  %v271_v5 = vmul.f32 %v1668_v58, %v1668_v58  ;;  %v383_v7 = vadd.f32 %v1651_v19, %v349_v17 }
 0x188   :  { %v1339_v0 = vpop.eup %1338  ;;  %v255_v6 = vpop.xlane.xlu1 %254  ;;  %v382_v8 = vadd.f32 %v1654_v21, %v348_v41  ;;  %v307_v13 = vsub.f32 %v1572_v23, %v1638_v4  ;;  %v309_v23 = vsub.f32 %v1584_v33, %v1658_v24  ;;  %v311_v33 = vsub.f32 %v1596_v53, %v1668_v58 }
 0x189   :  { %v286_v10 = vadd.f32 1e-05, %v278_v63  ;;  %v263_v36 = vmul.f32 0.00390625, %v255_v6  ;;  %v317_v60 = vmul.f32 %v1339_v0, %v301_v59  ;;  %v316_v25 = vmul.f32 %v1339_v0, %v300_v44 }
 0x18a   :  { %v399_v2 = vmax.f32 %v383_v7, 0.0  ;;  %v398_v18 = vmax.f32 %v382_v8, 0.0  ;;  %v306_v59 = vsub.f32 %v1569_v22, %v1638_v4  ;;  %v308_v6 = vsub.f32 %v1581_v32, %v1658_v24 }
 0x18b   :  { %1346 = vrsqrt.f32 %v286_v10  ;;  %v279_v20 = vsub.f32 %v263_v36, %v271_v5  ;;  %v351_v3 = vmul.f32 %v1645_v11, %v317_v60  ;;  %v350_v30 = vmul.f32 %v1648_v14, %v316_v25 }
 0x18c   :  { %v1341_v43 = vpop.eup %1340  ;;  %v414_v45 = vpack.c.bf16 %v399_v2, %v397_v15  ;;  %v413_v9 = vpack.c.bf16 %v398_v18, %v396_v16  ;;  %v310_v32 = vsub.f32 %v1593_v51, %v1668_v58 }
 0x18d   :  { %v287_v26 = vadd.f32 1e-05, %v279_v20  ;;  %v319_v27 = vmul.f32 %v1341_v43, %v303_v1  ;;  %v318_v28 = vmul.f32 %v1341_v43, %v302_v62  ;;  %v385_v38 = vadd.f32 %v1651_v19, %v351_v3 }
 0x18e   :  { %664 = vmatprep.mubr.bf16.mxu1 %v414_v45  ;;  %v384_v48 = vadd.f32 %v1654_v21, %v350_v30 }
 0x18f   :  { %1348 = vrsqrt.f32 %v287_v26  ;;  %665 = vmatmul.mubr.bf16.vlgmr.msra.gmra.mxu1 %v413_v9  ;;  %v353_v44 = vmul.f32 %v1645_v11, %v319_v27  ;;  %v352_v46 = vmul.f32 %v1648_v14, %v318_v28  ;;  %v401_v57 = vmax.f32 %v385_v38, 0.0 }
 0x190   :  { %v1343_v54 = vpop.eup %1342  ;;  %v400_v17 = vmax.f32 %v384_v48, 0.0 }
 0x191   :  { %v387_v55 = vadd.f32 %v1651_v19, %v353_v44  ;;  %v386_v56 = vadd.f32 %v1654_v21, %v352_v46  ;;  %v321_v12 = vmul.f32 %v1343_v54, %v305_v31  ;;  %v320_v47 = vmul.f32 %v1343_v54, %v304_v29 }
 0x193   :  { %v403_v52 = vmax.f32 %v387_v55, 0.0  ;;  %v402_v40 = vmax.f32 %v386_v56, 0.0  ;;  %v355_v41 = vmul.f32 %v1645_v11, %v321_v12  ;;  %v354_v62 = vmul.f32 %v1648_v14, %v320_v47 }
 0x194   :  { %v1345_v61 = vpop.eup %1344 }
 0x195   :  { %v416_v63 = vpack.c.bf16 %v403_v52, %v401_v57  ;;  %v415_v0 = vpack.c.bf16 %v402_v40, %v400_v17  ;;  %v323_v1 = vmul.f32 %v1345_v61, %v307_v13  ;;  %v322_v5 = vmul.f32 %v1345_v61, %v306_v59 }
 0x196   :  { %v389_v8 = vadd.f32 %v1651_v19, %v355_v41  ;;  %v388_v4 = vadd.f32 %v1654_v21, %v354_v62 }
 0x197   :  { %674 = vmatprep.mubr.bf16.mxu1 %v416_v63  ;;  %v357_v7 = vmul.f32 %v1645_v11, %v323_v1  ;;  %v356_v22 = vmul.f32 %v1648_v14, %v322_v5 }
 0x198   :  { %v1347_v10 = vpop.eup %1346  ;;  %675 = vmatmul.mubr.bf16.gmra.mxu1 %v415_v0  ;;  %v405_v15 = vmax.f32 %v389_v8, 0.0  ;;  %v404_v3 = vmax.f32 %v388_v4, 0.0 }
 0x199   :  { %v391_v36 = vadd.f32 %v1651_v19, %v357_v7  ;;  %v325_v60 = vmul.f32 %v1347_v10, %v309_v23  ;;  %v324_v25 = vmul.f32 %v1347_v10, %v308_v6  ;;  %v390_v24 = vadd.f32 %v1654_v21, %v356_v22 }
 0x19b   :  { %v407_v2 = vmax.f32 %v391_v36, 0.0  ;;  %v359_v16 = vmul.f32 %v1645_v11, %v325_v60  ;;  %v358_v18 = vmul.f32 %v1648_v14, %v324_v25  ;;  %v406_v30 = vmax.f32 %v390_v24, 0.0 }
 0x19c   :  { %v1349_v20 = vpop.eup %1348 }
 0x19d   :  { %v418_v43 = vpack.c.bf16 %v407_v2, %v405_v15  ;;  %v327_v45 = vmul.f32 %v1349_v20, %v311_v33  ;;  %v326_v9 = vmul.f32 %v1349_v20, %v310_v32  ;;  %v417_v26 = vpack.c.bf16 %v406_v30, %v404_v3 }
 0x19e   :  { %v393_v53 = vadd.f32 %v1651_v19, %v359_v16  ;;  %v392_v27 = vadd.f32 %v1654_v21, %v358_v18 }
 0x19f   :  { %684 = vmatprep.mubr.bf16.mxu1 %v418_v43  ;;  %v361_v51 = vmul.f32 %v1645_v11, %v327_v45  ;;  %v360_v58 = vmul.f32 %v1648_v14, %v326_v9  ;;  %v1729_v11 = vld [vmem:[%s2037_s4] sm:$0x77] }
 0x1a0   :  { %685 = vmatmul.mubr.bf16.gmra.mxu1 %v417_v26  ;;  %v409_v31 = vmax.f32 %v393_v53, 0.0  ;;  %v408_v44 = vmax.f32 %v392_v27, 0.0  ;;  %v457_v14 = vrot.slane %v1729_v11, %v1491_v35  ;;  %v1318_v53 = vld [vmem:[%s2038_s5 + $0x78] sm:$0xff]  }
 0x1a1   :  { %v395_v28 = vadd.f32 %v1651_v19, %v361_v51  ;;  %v394_v29 = vadd.f32 %v1654_v21, %v360_v58  ;;  %v461_v19 = vrot.slane %v1729_v11, %v64_v37  ;;  %v1319_v27 = vld [vmem:[%s2038_s5 + $0x38] sm:$0xff]   ;;  %1221 = vmatprep.subr.bf16.mxu0 %v1318_v53 }
 0x1a2   :  { %v1737_v21 = vrot.slane %v457_v14, %v1491_v35  ;;  %1222 = vmatpush3.bf16.msra.mxu0 %v1319_v27 }
 0x1a3   :  { %v411_v38 = vmax.f32 %v395_v28, 0.0  ;;  %v410_v46 = vmax.f32 %v394_v29, 0.0  ;;  %v1740_v55 = vrot.slane %v461_v19, %v1491_v35  ;;  %v1321_v19 = vld [vmem:[%s2038_s5 + $0x30] sm:$0xff]  }
 0x1a5   :  { %v420_v48 = vpack.c.bf16 %v411_v38, %v409_v31  ;;  %v419_v54 = vpack.c.bf16 %v410_v46, %v408_v44 }
 0x1a7   :  { %694 = vmatprep.mubr.bf16.mxu1 %v420_v48 }
 0x1a8   :  { %695 = vmatmul.mubr.bf16.gmra.mxu1 %v419_v54  ;;  %v1320_v54 = vld [vmem:[%s2038_s5 + $0x70] sm:$0xff]  }
 0x1a9   :  { %1223 = vmatprep.subr.bf16.mxu0 %v1320_v54 }
 0x1aa   :  { %1224 = vmatpush3.bf16.msra.mxu0 %v1321_v19 }
 0x24f   :  { %v666_v56 = vpop.f32.mrf.mxu1 }
 0x250   :  { %v1743_v47 = vadd.f32 %v666_v56, %v1737_v21 }
 0x251   :  { %v668_v12 = vpop.f32.mrf.mxu1 }
 0x252   :  { %v1746_v13 = vadd.f32 %v668_v12, %v1740_v55  ;;  %v737_v41 = vmul.f32 %v1743_v47, %v1743_v47 }
 0x253   :  { %v670_v57 = vpop.f32.mrf.mxu1 }
 0x254   :  { %v705_v52 = vadd.f32 %v1746_v13, %v1743_v47  ;;  %v738_v37 = vmul.f32 %v1746_v13, %v1746_v13  ;;  %v1753_v40 = vadd.f32 %v670_v57, %v1737_v21 }
 0x255   :  { %v672_v17 = vpop.f32.mrf.mxu1 }
 0x256   :  { %v1756_v35 = vadd.f32 %v672_v17, %v1740_v55  ;;  %706 = vadd.xlane.f32.xlu0 %v705_v52  ;;  %v753_v62 = vadd.f32 %v738_v37, %v737_v41  ;;  %v739_v1 = vmul.f32 %v1753_v40, %v1753_v40 }
 0x258   :  { %v676_v61 = vpop.f32.mrf.mxu1  ;;  %v708_v59 = vadd.f32 %v1756_v35, %v1753_v40  ;;  %v740_v63 = vmul.f32 %v1756_v35, %v1756_v35 }
 0x259   :  { %v1767_v5 = vadd.f32 %v676_v61, %v1737_v21  ;;  %v1322_v61 = vld [vmem:[%s2038_s5 + $0x68] sm:$0xff]  }
 0x25a   :  { %709 = vadd.xlane.f32.xlu1 %v708_v59  ;;  %754 = vadd.xlane.f32.xlu0 %v753_v62  ;;  %v678_v0 = vpop.f32.mrf.mxu1  ;;  %v756_v7 = vadd.f32 %v740_v63, %v739_v1  ;;  %v1323_v59 = vld [vmem:[%s2038_s5 + $0x28] sm:$0xff]   ;;  %v1325_v1 = vld [vmem:[%s2038_s5 + $0x20] sm:$0xff]  }
 0x25b   :  { %v1770_v6 = vadd.f32 %v678_v0, %v1740_v55  ;;  %v741_v60 = vmul.f32 %v1767_v5, %v1767_v5  ;;  %1225 = vmatprep.subr.bf16.mxu0 %v1322_v61  ;;  %v1324_v0 = vld [vmem:[%s2038_s5 + $0x60] sm:$0xff]  }
 0x25c   :  { %v680_v23 = vpop.f32.mrf.mxu1  ;;  %1226 = vmatpush3.bf16.msra.mxu0 %v1323_v59 }
 0x25d   :  { %v711_v8 = vadd.f32 %v1770_v6, %v1767_v5  ;;  %v742_v10 = vmul.f32 %v1770_v6, %v1770_v6  ;;  %v1777_v4 = vadd.f32 %v680_v23, %v1737_v21  ;;  %1227 = vmatprep.subr.bf16.mxu0 %v1324_v0 }
 0x25e   :  { %757 = vadd.xlane.f32.xlu1 %v756_v7  ;;  %v682_v22 = vpop.f32.mrf.mxu1  ;;  %v1326_v7 = vld [vmem:[%s2038_s5 + $0x58] sm:$0xff]  }
 0x25f   :  { %v1780_v36 = vadd.f32 %v682_v22, %v1740_v55  ;;  %712 = vadd.xlane.f32.xlu0 %v711_v8  ;;  %v759_v33 = vadd.f32 %v742_v10, %v741_v60  ;;  %v743_v18 = vmul.f32 %v1777_v4, %v1777_v4  ;;  %v1327_v8 = vld [vmem:[%s2038_s5 + $0x18] sm:$0xff]   ;;  %v1328_v10 = vld [vmem:[%s2038_s5 + $0x50] sm:$0xff]   ;;  %v1330_v60 = vld [vmem:[%s2038_s5 + $0x48] sm:$0xff]  }
 0x260   :  { %v686_v25 = vpop.f32.mrf.mxu1  ;;  %1228 = vmatpush3.bf16.msra.mxu0 %v1325_v1  ;;  %v1329_v22 = vld [vmem:[%s2038_s5 + $0x10] sm:$0xff]  }
 0x261   :  { %v714_v32 = vadd.f32 %v1780_v36, %v1777_v4  ;;  %v744_v24 = vmul.f32 %v1780_v36, %v1780_v36  ;;  %v1789_v2 = vadd.f32 %v686_v25, %v1737_v21  ;;  %1229 = vmatprep.subr.bf16.mxu0 %v1326_v7  ;;  %v1331_v25 = vld [vmem:[%s2038_s5 + $0x8] sm:$0xff]   ;;  %v886_v7 = vrot.slane %v1729_v11, %v1621_v49 }
 0x262   :  { %v688_v15 = vpop.f32.mrf.mxu1 }
 0x263   :  { %v1792_v16 = vadd.f32 %v688_v15, %v1740_v55  ;;  %715 = vadd.xlane.f32.xlu1 %v714_v32  ;;  %760 = vadd.xlane.f32.xlu0 %v759_v33  ;;  %v762_v3 = vadd.f32 %v744_v24, %v743_v18  ;;  %v745_v51 = vmul.f32 %v1789_v2, %v1789_v2  ;;  %v1332_v32 = vld [vmem:[%s2038_s5 + $0x40] sm:$0xff]  }
 0x264   :  { %v690_v20 = vpop.f32.mrf.mxu1  ;;  %1230 = vmatpush3.bf16.msra.mxu0 %v1327_v8  ;;  %v1333_v33 = vld [vmem:[%s2038_s5] sm:$0xff]  }
 0x265   :  { %v717_v30 = vadd.f32 %v1792_v16, %v1789_v2  ;;  %v746_v43 = vmul.f32 %v1792_v16, %v1792_v16  ;;  %v1801_v9 = vadd.f32 %v690_v20, %v1737_v21  ;;  %1231 = vmatprep.subr.bf16.mxu0 %v1328_v10 }
 0x266   :  { %v692_v45 = vpop.f32.mrf.mxu1 }
 0x267   :  { %v1804_v26 = vadd.f32 %v692_v45, %v1740_v55  ;;  %763 = vadd.xlane.f32.xlu1 %v762_v3  ;;  %718 = vadd.xlane.f32.xlu0 %v717_v30  ;;  %v765_v29 = vadd.f32 %v746_v43, %v745_v51  ;;  %v747_v48 = vmul.f32 %v1801_v9, %v1801_v9 }
 0x268   :  { %v696_v58 = vpop.f32.mrf.mxu1  ;;  %1232 = vmatpush3.bf16.msra.mxu0 %v1329_v22 }
 0x269   :  { %v720_v28 = vadd.f32 %v1804_v26, %v1801_v9  ;;  %v748_v31 = vmul.f32 %v1804_v26, %v1804_v26  ;;  %v1819_v44 = vadd.f32 %v696_v58, %v1737_v21  ;;  %1233 = vmatprep.subr.bf16.mxu0 %v1330_v60 }
 0x26a   :  { %v698_v38 = vpop.f32.mrf.mxu1 }
 0x26b   :  { %v1822_v46 = vadd.f32 %v698_v38, %v1740_v55  ;;  %721 = vadd.xlane.f32.xlu1 %v720_v28  ;;  %766 = vadd.xlane.f32.xlu0 %v765_v29  ;;  %v768_v56 = vadd.f32 %v748_v31, %v747_v48  ;;  %v749_v41 = vmul.f32 %v1819_v44, %v1819_v44 }
 0x26c   :  { %v700_v14 = vpop.f32.mrf.mxu1  ;;  %1234 = vmatpush3.bf16.msra.mxu0 %v1331_v25 }
 0x26d   :  { %v723_v12 = vadd.f32 %v1822_v46, %v1819_v44  ;;  %v750_v57 = vmul.f32 %v1822_v46, %v1822_v46  ;;  %v1837_v37 = vadd.f32 %v700_v14, %v1737_v21  ;;  %1235 = vmatprep.subr.bf16.mxu0 %v1332_v32 }
 0x26e   :  { %v702_v52 = vpop.f32.mrf.mxu1 }
 0x26f   :  { %v1840_v17 = vadd.f32 %v702_v52, %v1740_v55  ;;  %769 = vadd.xlane.f32.xlu1 %v768_v56  ;;  %724 = vadd.xlane.f32.xlu0 %v723_v12  ;;  %v771_v62 = vadd.f32 %v750_v57, %v749_v41  ;;  %v751_v63 = vmul.f32 %v1837_v37, %v1837_v37 }
 0x270   :  { %1236 = vmatpush3.bf16.msra.mxu0 %v1333_v33 }
 0x271   :  { %v726_v21 = vadd.f32 %v1840_v17, %v1837_v37  ;;  %v752_v55 = vmul.f32 %v1840_v17, %v1840_v17 }
 0x273   :  { %727 = vadd.xlane.f32.xlu1 %v726_v21  ;;  %772 = vadd.xlane.f32.xlu0 %v771_v62  ;;  %v774_v23 = vadd.f32 %v752_v55, %v751_v63  ;;  %v856_v62 = vrot.slane %v1729_v11, %v334_v42  ;;  %v852_v55 = vrot.slane %v1729_v11, %v1617_v39 }
 0x275   :  { %v1917_v32 = vrot.slane %v856_v62, %v1617_v39  ;;  %v1920_v34 = vrot.slane %v852_v55, %v1617_v39 }
 0x277   :  { %775 = vadd.xlane.f32.xlu1 %v774_v23  ;;  %v890_v23 = vrot.slane %v1729_v11, %v368_v50 }
 0x2df   :  { %v707_v24 = vpop.xlane.xlu0 %706 }
 0x2e0   :  { %v729_v15 = vmul.f32 0.00390625, %v707_v24 }
 0x2e2   :  { %v785_v30 = vmul.f32 %v729_v15, %v729_v15  ;;  %v817_v60 = vsub.f32 %v1743_v47, %v729_v15  ;;  %v818_v25 = vsub.f32 %v1746_v13, %v729_v15  ;;  %v1926_v47 = vrot.slane %v886_v7, %v1621_v49 }
 0x2e3   :  { %v710_v18 = vpop.xlane.xlu1 %709  ;;  %v755_v20 = vpop.xlane.xlu0 %754 }
 0x2e4   :  { %v1886_v3 = vmul.f32 0.00390625, %v710_v18  ;;  %v777_v43 = vmul.f32 0.00390625, %v755_v20 }
 0x2e6   :  { %v793_v45 = vsub.f32 %v777_v43, %v785_v30  ;;  %v786_v58 = vmul.f32 %v1886_v3, %v1886_v3  ;;  %v1923_v30 = vrot.slane %v890_v23, %v1621_v49 }
 0x2e7   :  { %v758_v51 = vpop.xlane.xlu1 %757 }
 0x2e8   :  { %v801_v53 = vadd.f32 1e-05, %v793_v45  ;;  %v778_v27 = vmul.f32 0.00390625, %v758_v51  ;;  %v713_v28 = vpop.xlane.xlu0 %712  ;;  %v819_v45 = vsub.f32 %v1753_v40, %v1886_v3  ;;  %v820_v51 = vsub.f32 %v1756_v35, %v1886_v3 }
 0x2e9   :  { %v1890_v29 = vmul.f32 0.00390625, %v713_v28 }
 0x2ea   :  { %1350 = vrsqrt.f32 %v801_v53  ;;  %v794_v31 = vsub.f32 %v778_v27, %v786_v58 }
 0x2eb   :  { %v787_v19 = vmul.f32 %v1890_v29, %v1890_v29 }
 0x2ec   :  { %v802_v38 = vadd.f32 1e-05, %v794_v31  ;;  %v716_v48 = vpop.xlane.xlu1 %715  ;;  %v761_v54 = vpop.xlane.xlu0 %760  ;;  %v821_v31 = vsub.f32 %v1767_v5, %v1890_v29  ;;  %v822_v5 = vsub.f32 %v1770_v6, %v1890_v29 }
 0x2ed   :  { %v1892_v14 = vmul.f32 0.00390625, %v716_v48  ;;  %v779_v56 = vmul.f32 0.00390625, %v761_v54 }
 0x2ee   :  { %1352 = vrsqrt.f32 %v802_v38 }
 0x2ef   :  { %v795_v12 = vsub.f32 %v779_v56, %v787_v19  ;;  %v788_v61 = vmul.f32 %v1892_v14, %v1892_v14  ;;  %v824_v62 = vsub.f32 %v1780_v36, %v1892_v14 }
 0x2f0   :  { %v764_v57 = vpop.xlane.xlu1 %763  ;;  %v719_v52 = vpop.xlane.xlu0 %718 }
 0x2f1   :  { %v803_v41 = vadd.f32 1e-05, %v795_v12  ;;  %v780_v59 = vmul.f32 0.00390625, %v764_v57  ;;  %v1898_v21 = vmul.f32 0.00390625, %v719_v52 }
 0x2f3   :  { %1354 = vrsqrt.f32 %v803_v41  ;;  %v796_v63 = vsub.f32 %v780_v59, %v788_v61  ;;  %v789_v42 = vmul.f32 %v1898_v21, %v1898_v21  ;;  %v823_v41 = vsub.f32 %v1777_v4, %v1892_v14 }
 0x2f4   :  { %v722_v0 = vpop.xlane.xlu1 %721  ;;  %v767_v1 = vpop.xlane.xlu0 %766 }
 0x2f5   :  { %v804_v8 = vadd.f32 1e-05, %v796_v63  ;;  %v1910_v10 = vmul.f32 0.00390625, %v722_v0  ;;  %v781_v22 = vmul.f32 0.00390625, %v767_v1 }
 0x2f7   :  { %v1351_v50 = vpop.eup %1350  ;;  %1356 = vrsqrt.f32 %v804_v8  ;;  %v797_v11 = vsub.f32 %v781_v22, %v789_v42  ;;  %v790_v15 = vmul.f32 %v1910_v10, %v1910_v10 }
 0x2f8   :  { %v833_v33 = vmul.f32 %v1351_v50, %v817_v60  ;;  %v770_v24 = vpop.xlane.xlu1 %769  ;;  %v725_v18 = vpop.xlane.xlu0 %724  ;;  %v834_v20 = vmul.f32 %v1351_v50, %v818_v25 }
 0x2f9   :  { %v805_v13 = vadd.f32 1e-05, %v797_v11  ;;  %v782_v43 = vmul.f32 0.00390625, %v770_v24  ;;  %v1930_v39 = vmul.f32 0.00390625, %v725_v18 }
 0x2fa   :  { %v868_v53 = vmul.f32 %v1917_v32, %v834_v20  ;;  %v867_v58 = vmul.f32 %v1920_v34, %v833_v33  ;;  %v825_v20 = vsub.f32 %v1789_v2, %v1898_v21 }
 0x2fb   :  { %v1353_v27 = vpop.eup %1352  ;;  %1358 = vrsqrt.f32 %v805_v13  ;;  %v798_v49 = vsub.f32 %v782_v43, %v790_v15  ;;  %v791_v40 = vmul.f32 %v1930_v39, %v1930_v39  ;;  %v826_v13 = vsub.f32 %v1792_v16, %v1898_v21 }
 0x2fc   :  { %v835_v28 = vmul.f32 %v1353_v27, %v819_v45  ;;  %v728_v38 = vpop.xlane.xlu1 %727  ;;  %v773_v48 = vpop.xlane.xlu0 %772  ;;  %v836_v54 = vmul.f32 %v1353_v27, %v820_v51  ;;  %v902_v12 = vadd.f32 %v1923_v30, %v868_v53  ;;  %v901_v52 = vadd.f32 %v1926_v47, %v867_v58 }
 0x2fd   :  { %v806_v19 = vadd.f32 1e-05, %v798_v49  ;;  %v1940_v56 = vmul.f32 0.00390625, %v728_v38  ;;  %v783_v35 = vmul.f32 0.00390625, %v773_v48  ;;  %v828_v16 = vsub.f32 %v1804_v26, %v1910_v10 }
 0x2fe   :  { %v870_v3 = vmul.f32 %v1917_v32, %v836_v54  ;;  %v869_v57 = vmul.f32 %v1920_v34, %v835_v28  ;;  %v918_v8 = vmax.f32 %v902_v12, 0.0  ;;  %v917_v42 = vmax.f32 %v901_v52, 0.0 }
 0x2ff   :  { %1360 = vrsqrt.f32 %v806_v19  ;;  %v799_v61 = vsub.f32 %v783_v35, %v791_v40  ;;  %v792_v55 = vmul.f32 %v1940_v56, %v1940_v56  ;;  %v827_v19 = vsub.f32 %v1801_v9, %v1910_v10 }
 0x300   :  { %v1355_v59 = vpop.eup %1354  ;;  %v776_v63 = vpop.xlane.xlu1 %775  ;;  %v904_v0 = vadd.f32 %v1923_v30, %v870_v3  ;;  %v903_v1 = vadd.f32 %v1926_v47, %v869_v57  ;;  %v829_v52 = vsub.f32 %v1819_v44, %v1930_v39  ;;  %v830_v26 = vsub.f32 %v1822_v46, %v1930_v39 }
 0x301   :  { %v807_v23 = vadd.f32 1e-05, %v799_v61  ;;  %v784_v7 = vmul.f32 0.00390625, %v776_v63  ;;  %v838_v6 = vmul.f32 %v1355_v59, %v822_v5  ;;  %v837_v29 = vmul.f32 %v1355_v59, %v821_v31 }
 0x302   :  { %v920_v4 = vmax.f32 %v904_v0, 0.0  ;;  %v919_v22 = vmax.f32 %v903_v1, 0.0  ;;  %v831_v44 = vsub.f32 %v1837_v37, %v1940_v56  ;;  %v832_v46 = vsub.f32 %v1840_v17, %v1940_v56 }
 0x303   :  { %1362 = vrsqrt.f32 %v807_v23  ;;  %v800_v60 = vsub.f32 %v784_v7, %v792_v55  ;;  %v872_v36 = vmul.f32 %v1917_v32, %v838_v6  ;;  %v871_v14 = vmul.f32 %v1920_v34, %v837_v29 }
 0x304   :  { %v1357_v25 = vpop.eup %1356  ;;  %v934_v50 = vpack.c.bf16 %v920_v4, %v918_v8  ;;  %v933_v11 = vpack.c.bf16 %v919_v22, %v917_v42 }
 0x305   :  { %v808_v33 = vadd.f32 1e-05, %v800_v60  ;;  %v840_v24 = vmul.f32 %v1357_v25, %v824_v62  ;;  %v839_v18 = vmul.f32 %v1357_v25, %v823_v41  ;;  %v906_v15 = vadd.f32 %v1923_v30, %v872_v36 }
 0x306   :  { %1108 = vmatprep.mubr.bf16.mxu0 %v934_v50  ;;  %v905_v51 = vadd.f32 %v1926_v47, %v871_v14 }
 0x307   :  { %1364 = vrsqrt.f32 %v808_v33  ;;  %1109 = vmatmul.mubr.bf16.vlgmr.msra.gmra.mxu0 %v933_v11  ;;  %v874_v43 = vmul.f32 %v1917_v32, %v840_v24  ;;  %v873_v45 = vmul.f32 %v1920_v34, %v839_v18  ;;  %v922_v21 = vmax.f32 %v906_v15, 0.0 }
 0x308   :  { %v1359_v53 = vpop.eup %1358  ;;  %v921_v31 = vmax.f32 %v905_v51, 0.0 }
 0x309   :  { %v908_v58 = vadd.f32 %v1923_v30, %v874_v43  ;;  %v907_v27 = vadd.f32 %v1926_v47, %v873_v45  ;;  %v842_v2 = vmul.f32 %v1359_v53, %v826_v13  ;;  %v841_v49 = vmul.f32 %v1359_v53, %v825_v20 }
 0x30b   :  { %v924_v28 = vmax.f32 %v908_v58, 0.0  ;;  %v923_v38 = vmax.f32 %v907_v27, 0.0  ;;  %v876_v48 = vmul.f32 %v1917_v32, %v842_v2  ;;  %v875_v40 = vmul.f32 %v1920_v34, %v841_v49 }
 0x30c   :  { %v1361_v54 = vpop.eup %1360 }
 0x30d   :  { %v936_v35 = vpack.c.bf16 %v924_v28, %v922_v21  ;;  %v935_v3 = vpack.c.bf16 %v923_v38, %v921_v31  ;;  %v844_v12 = vmul.f32 %v1361_v54, %v828_v16  ;;  %v843_v57 = vmul.f32 %v1361_v54, %v827_v19 }
 0x30e   :  { %v910_v41 = vadd.f32 %v1923_v30, %v876_v48  ;;  %v909_v10 = vadd.f32 %v1926_v47, %v875_v40 }
 0x30f   :  { %1116 = vmatprep.mubr.bf16.mxu0 %v936_v35  ;;  %v878_v5 = vmul.f32 %v1917_v32, %v844_v12  ;;  %v877_v9 = vmul.f32 %v1920_v34, %v843_v57 }
 0x310   :  { %v1363_v61 = vpop.eup %1362  ;;  %1117 = vmatmul.mubr.bf16.gmra.mxu0 %v935_v3  ;;  %v926_v63 = vmax.f32 %v910_v41, 0.0  ;;  %v925_v6 = vmax.f32 %v909_v10, 0.0 }
 0x311   :  { %v912_v59 = vadd.f32 %v1923_v30, %v878_v5  ;;  %v846_v62 = vmul.f32 %v1363_v61, %v830_v26  ;;  %v845_v55 = vmul.f32 %v1363_v61, %v829_v52  ;;  %v911_v39 = vadd.f32 %v1926_v47, %v877_v9 }
 0x313   :  { %v928_v0 = vmax.f32 %v912_v59, 0.0  ;;  %v880_v1 = vmul.f32 %v1917_v32, %v846_v62  ;;  %v879_v23 = vmul.f32 %v1920_v34, %v845_v55  ;;  %v927_v29 = vmax.f32 %v911_v39, 0.0 }
 0x314   :  { %v1365_v7 = vpop.eup %1364 }
 0x315   :  { %v938_v8 = vpack.c.bf16 %v928_v0, %v926_v63  ;;  %v848_v4 = vmul.f32 %v1365_v7, %v832_v46  ;;  %v847_v42 = vmul.f32 %v1365_v7, %v831_v44  ;;  %v937_v22 = vpack.c.bf16 %v927_v29, %v925_v6 }
 0x316   :  { %v914_v17 = vadd.f32 %v1923_v30, %v880_v1  ;;  %v913_v60 = vadd.f32 %v1926_v47, %v879_v23 }
 0x317   :  { %1124 = vmatprep.mubr.bf16.mxu0 %v938_v8  ;;  %v882_v37 = vmul.f32 %v1917_v32, %v848_v4  ;;  %v881_v56 = vmul.f32 %v1920_v34, %v847_v42  ;;  %v1204_v34 = vld [vmem:[%s2039_s6] ss:$0 sm:$0xff] }
 0x318   :  { %1125 = vmatmul.mubr.bf16.gmra.mxu0 %v937_v22  ;;  %v930_v25 = vmax.f32 %v914_v17, 0.0  ;;  %v929_v11 = vmax.f32 %v913_v60, 0.0 }
 0x319   :  { %v916_v36 = vadd.f32 %v1923_v30, %v882_v37  ;;  %v915_v14 = vadd.f32 %v1926_v47, %v881_v56 }
 0x31b   :  { %v932_v50 = vmax.f32 %v916_v36, 0.0  ;;  %v931_v33 = vmax.f32 %v915_v14, 0.0 }
 0x31d   :  { %v940_v24 = vpack.c.bf16 %v932_v50, %v930_v25  ;;  %v939_v18 = vpack.c.bf16 %v931_v33, %v929_v11 }
 0x31f   :  { %1132 = vmatprep.mubr.bf16.mxu0 %v940_v24 }
 0x320   :  { %1133 = vmatmul.mubr.bf16.gmra.mxu0 %v939_v18 }
 0x3c7   :  { %v1237_v32 = vpop.f32.mrf.mxu0 }
 0x3c9   :  { %v1238_v20 = vpop.f32.mrf.mxu0 }
 0x3ca   :  { %v1239_v13 = vadd.f32 %v1238_v20, %v1237_v32 }
 0x3cb   :  { %v1240_v15 = vpop.f32.mrf.mxu0 }
 0x3cc   :  { %v1111_v43 = vadd.f32 %v1239_v13, %v1204_v34 }
 0x3cd   :  { %v1241_v30 = vpop.f32.mrf.mxu0 }
 0x3ce   :  { %1366 = vtanh.f32 %v1111_v43  ;;  %v1242_v47 = vadd.f32 %v1241_v30, %v1240_v15 }
 0x3d0   :  { %v1114_v45 = vadd.f32 %v1242_v47, %v1204_v34  ;;  %v1243_v51 = vpop.f32.mrf.mxu0 }
 0x3d2   :  { %1368 = vtanh.f32 %v1114_v45  ;;  %v1244_v53 = vpop.f32.mrf.mxu0 }
 0x3d3   :  { %v1245_v58 = vadd.f32 %v1244_v53, %v1243_v51 }
 0x3d4   :  { %v1246_v27 = vpop.f32.mrf.mxu0 }
 0x3d5   :  { %v1119_v2 = vadd.f32 %v1245_v58, %v1204_v34 }
 0x3d6   :  { %v1247_v49 = vpop.f32.mrf.mxu0 }
 0x3d7   :  { %1370 = vtanh.f32 %v1119_v2  ;;  %v1248_v16 = vadd.f32 %v1247_v49, %v1246_v27 }
 0x3d8   :  { %v1249_v21 = vpop.f32.mrf.mxu0 }
 0x3d9   :  { %v1122_v28 = vadd.f32 %v1248_v16, %v1204_v34 }
 0x3da   :  { %v1250_v31 = vpop.f32.mrf.mxu0 }
 0x3db   :  { %v1367_v38 = vpop.eup %1366  ;;  %1372 = vtanh.f32 %v1122_v28  ;;  %v1251_v48 = vadd.f32 %v1250_v31, %v1249_v21 }
 0x3dc   :  { %1150 = vst.msk [vmem:[%s2040_s7] sm:$0xff] %vm1149_vm2, %v1367_v38  ;;  %v1252_v54 = vpop.f32.mrf.mxu0 }
 0x3dd   :  { %v1127_v19 = vadd.f32 %v1251_v48, %v1204_v34 }
 0x3de   :  { %v1253_v40 = vpop.f32.mrf.mxu0 }
 0x3df   :  { %v1369_v35 = vpop.eup %1368  ;;  %1374 = vtanh.f32 %v1127_v19  ;;  %v1254_v3 = vadd.f32 %v1253_v40, %v1252_v54 }
 0x3e0   :  { %1151 = vst.msk [vmem:[%s2040_s7 + $0x8] sm:$0xff] %vm1149_vm2, %v1369_v35  ;;  %v1255_v12 = vpop.f32.mrf.mxu0 }
 0x3e1   :  { %v1130_v57 = vadd.f32 %v1254_v3, %v1204_v34 }
 0x3e2   :  { %v1256_v52 = vpop.f32.mrf.mxu0 }
 0x3e3   :  { %1376 = vtanh.f32 %v1130_v57  ;;  %v1257_v26 = vadd.f32 %v1256_v52, %v1255_v12 }
 0x3e4   :  { %v1371_v5 = vpop.eup %1370  ;;  %v1258_v41 = vpop.f32.mrf.mxu0 }
 0x3e5   :  { %1152 = vst.msk [vmem:[%s2040_s7 + $0x10] sm:$0xff] %vm1149_vm2, %v1371_v5  ;;  %v1135_v61 = vadd.f32 %v1257_v26, %v1204_v34 }
 0x3e6   :  { %v1259_v9 = vpop.f32.mrf.mxu0 }
 0x3e7   :  { %1378 = vtanh.f32 %v1135_v61  ;;  %v1260_v10 = vadd.f32 %v1259_v9, %v1258_v41 }
 0x3e8   :  { %v1373_v59 = vpop.eup %1372 }
 0x3e9   :  { %1153 = vst.msk [vmem:[%s2040_s7 + $0x18] sm:$0xff] %vm1149_vm2, %v1373_v59  ;;  %v1138_v62 = vadd.f32 %v1260_v10, %v1204_v34 }
 0x3eb   :  { %1380 = vtanh.f32 %v1138_v62 }
 0x3ec   :  { %v1375_v55 = vpop.eup %1374 }
 0x3ed   :  { %1154 = vst.msk [vmem:[%s2040_s7 + $0x20] sm:$0xff] %vm1149_vm2, %v1375_v55 }
 0x3f0   :  { %v1377_v44 = vpop.eup %1376 }
 0x3f1   :  { %1155 = vst.msk [vmem:[%s2040_s7 + $0x28] sm:$0xff] %vm1149_vm2, %v1377_v44 }
 0x3f4   :  { %v1379_v46 = vpop.eup %1378 }
 0x3f5   :  { %1156 = vst.msk [vmem:[%s2040_s7 + $0x30] sm:$0xff] %vm1149_vm2, %v1379_v46 }
 0x3f8   :  { %v1381_v39 = vpop.eup %1380 }
 0x3f9   :  { %1157 = vst.msk [vmem:[%s2040_s7 + $0x38] sm:$0xff] %vm1149_vm2, %v1381_v39 }
 0x3fa   :  { %1162 = vsyncpa [#allocation3], 1 }

</bundles_post_ra>
